<compile_context>
chip_gen: v7x
topology: tpu7x:2x2x1
jax: 0.10.0
libtpu: 0.0.40
codegen_flags: <defaults>
</compile_context>

<pallas_src>
import functools
import math

import jax
import jax.numpy as jnp
from jax.experimental import pallas as pl
from jax.experimental.pallas import tpu as pltpu


def _decoder_kernel(hidden_dim, batch_block, time_chunk, vocab_pad,
                    z_ref, w1_ref, b1_ref, wih_ref, whh_ref, bg_ref,
                    wout_ref, bout_ref, out_ref, h_ref, c_ref, hs_ref):
    H = hidden_dim
    Bb = batch_block
    K = time_chunk
    Vp = vocab_pad
    f32 = jnp.float32
    bf16 = jnp.bfloat16

    j = pl.program_id(1)            # time-chunk index (serial / "arbitrary")

    # ---- reset LSTM state at the first time chunk of this batch block ------
    @pl.when(j == 0)
    def _():
        h_ref[...] = jnp.zeros_like(h_ref)
        c_ref[...] = jnp.zeros_like(c_ref)

    # ---- latent -> hidden (time-invariant; tiny, recomputed per chunk) -----
    z = z_ref[...]                                                    # (Bb, L) f32
    h0 = jnp.dot(z.astype(bf16), w1_ref[...],
                 preferred_element_type=f32) + b1_ref[...]            # (Bb, H) f32

    # LSTM input is the same vector every timestep -> input projection is
    # time-invariant.  Fused gate layout: columns [i | f | o | g], each H wide.
    x_proj = jnp.dot(h0.astype(bf16), wih_ref[...],
                     preferred_element_type=f32) + bg_ref[...]        # (Bb, 4H) f32
    whh = whh_ref[...]                                                # (H, 4H) bf16

    # ---- recurrence: ONE fused (Bb,H)@(H,4H) matmul per step ---------------
    def step(k, carry):
        h, c = carry
        gates = x_proj + jnp.dot(h.astype(bf16), whh,
                                 preferred_element_type=f32)          # (Bb, 4H) f32
        s = jax.nn.sigmoid(gates[:, :3 * H])                          # i, f, o
        g = jnp.tanh(gates[:, 3 * H:])                                # g
        i_g = s[:, :H]
        f_g = s[:, H:2 * H]
        o_g = s[:, 2 * H:3 * H]
        c_new = f_g * c + i_g * g
        h_new = o_g * jnp.tanh(c_new)
        off = pl.multiple_of(k * Bb, Bb)                              # aligned store
        hs_ref[pl.ds(off, Bb), :] = h_new.astype(bf16)
        return h_new, c_new

    h, c = jax.lax.fori_loop(0, K, step, (h_ref[...], c_ref[...]),
                             unroll=min(K, 8))
    h_ref[...] = h
    c_ref[...] = c

    # ---- hoisted-per-chunk output head: one (K*Bb, H) @ (H, Vp) matmul -----
    proj = (jnp.dot(hs_ref[...], wout_ref[...],
                    preferred_element_type=f32)
            + bout_ref[...]).astype(out_ref.dtype)                    # (K*Bb, Vp)
    # Output block is (Bb, K*Vp), rows = batch, lanes = (t_local, vocab):
    # lane-aligned (multiple-of-128 offsets), unmasked, dense stores.
    for k in range(K):
        out_ref[:, k * Vp:(k + 1) * Vp] = proj[k * Bb:(k + 1) * Bb, :]


def prepare_params(params, *, lane=128):
    """One-time weight prep: transpose to (in, out), fuse+reorder LSTM gates to
    [i, f, o, g] along the output dim, fold the two LSTM biases, pad vocab to a
    lane multiple, cast MXU operands to bf16."""
    H = params["lh_w"].shape[0]
    V = params["out_w"].shape[0]
    Vp = ((V + lane - 1) // lane) * lane
    bf16, f32 = jnp.bfloat16, jnp.float32
    perm = jnp.array([0, 1, 3, 2])      # torch gate order i,f,g,o -> i,f,o,g

    w1 = params["lh_w"].T.astype(bf16)                                # (L, H)
    b1 = params["lh_b"].reshape(1, H).astype(f32)                     # (1, H)

    def cat_gates(w):                    # torch (4H, H) -> fused (H, 4H)
        w4 = w.reshape(4, H, H)[perm]                                 # (4, out, in)
        return jnp.transpose(w4, (2, 0, 1)).reshape(H, 4 * H)         # (in, 4*out)

    wih = cat_gates(params["w_ih"]).astype(bf16)                      # (H, 4H)
    whh = cat_gates(params["w_hh"]).astype(bf16)                      # (H, 4H)
    bg = (params["b_ih"] + params["b_hh"]).reshape(4, H)[perm]
    bg = bg.reshape(1, 4 * H).astype(f32)                             # (1, 4H)

    wout = jnp.zeros((H, Vp), bf16).at[:, :V].set(params["out_w"].T.astype(bf16))
    bout = jnp.zeros((1, Vp), f32).at[:, :V].set(params["out_b"])

    return {
        "w1": w1, "b1": b1, "wih": wih, "whh": whh, "bg": bg,
        "wout": wout, "bout": bout,
        "hidden_dim": H, "vocab_size": V, "vocab_pad": Vp,
    }


def decoder_forward(z, prep, sequence_length, *, batch_block=16, time_chunk=8,
                    out_dtype=jnp.bfloat16):
    """Fused decoder (linear -> LSTM -> linear) in one Pallas kernel.

    Returns (B, T, V) logits in `out_dtype` (bf16 by default: halves the HBM
    writeback of the dominant tensor; accumulation stays f32)."""
    B, L = z.shape
    H = prep["hidden_dim"]
    V = prep["vocab_size"]
    Vp = prep["vocab_pad"]
    T = sequence_length

    Bb = batch_block                        # 16 = bf16 sublane-packed batch tile
    Bp = max(Bb, ((B + Bb - 1) // Bb) * Bb)
    if Bp != B:
        z = jnp.zeros((Bp, L), z.dtype).at[:B].set(z)
    nbb = Bp // Bb

    K = math.gcd(T, max(1, min(time_chunk, T)))   # chunk length dividing T
    n_chunks = T // K

    args = (z, prep["w1"], prep["b1"], prep["wih"], prep["whh"], prep["bg"],
            prep["wout"], prep["bout"])

    in_specs = [
        pl.BlockSpec((Bb, L), lambda i, j: (i, 0)),          # z: per batch block
        pl.BlockSpec((L, H), lambda i, j: (0, 0)),           # w1
        pl.BlockSpec((1, H), lambda i, j: (0, 0)),           # b1
        pl.BlockSpec((H, 4 * H), lambda i, j: (0, 0)),       # wih (fused)
        pl.BlockSpec((H, 4 * H), lambda i, j: (0, 0)),       # whh (fused)
        pl.BlockSpec((1, 4 * H), lambda i, j: (0, 0)),       # fused bias
        pl.BlockSpec((H, Vp), lambda i, j: (0, 0)),          # wout
        pl.BlockSpec((1, Vp), lambda i, j: (0, 0)),          # bout
    ]
    # Output rows = batch, lanes = (t, vocab): host side needs only a free
    # reshape (no transpose re-streaming the logits through HBM).
    out_spec = pl.BlockSpec((Bb, K * Vp), lambda i, j: (i, j))

    kernel = functools.partial(_decoder_kernel, H, Bb, K, Vp)

    out = pl.pallas_call(
        kernel,
        out_shape=jax.ShapeDtypeStruct((Bp, T * Vp), out_dtype),
        grid=(nbb, n_chunks),
        in_specs=in_specs,
        out_specs=out_spec,
        scratch_shapes=[
            pltpu.VMEM((Bb, H), jnp.float32),        # h state (persists)
            pltpu.VMEM((Bb, H), jnp.float32),        # c state (persists)
            pltpu.VMEM((K * Bb, H), jnp.bfloat16),   # per-chunk hidden states
        ],
        compiler_params=pltpu.CompilerParams(
            dimension_semantics=("parallel", "arbitrary"),
            vmem_limit_bytes=64 * 1024 * 1024),
    )(*args)

    out = out.reshape(Bp, T, Vp)            # free reshape (no data movement)
    return out[:B, :, :V]                   # drop batch / vocab padding only


def init_params(key, vocab_size, hidden_dim, latent_dim):
    """Deterministic PyTorch-style (uniform +-1/sqrt(fan_in)) initialization."""
    ks = jax.random.split(key, 8)

    def u(k, shape, fan_in):
        bound = 1.0 / (fan_in ** 0.5)
        return jax.random.uniform(k, shape, jnp.float32, -bound, bound)

    return {
        # latent_to_hidden: nn.Linear(latent_dim, hidden_dim)
        "lh_w": u(ks[0], (hidden_dim, latent_dim), latent_dim),
        "lh_b": u(ks[1], (hidden_dim,), latent_dim),
        # lstm: nn.LSTM(hidden_dim, hidden_dim), single layer, gate order i,f,g,o
        "w_ih": u(ks[2], (4 * hidden_dim, hidden_dim), hidden_dim),
        "w_hh": u(ks[3], (4 * hidden_dim, hidden_dim), hidden_dim),
        "b_ih": u(ks[4], (4 * hidden_dim,), hidden_dim),
        "b_hh": u(ks[5], (4 * hidden_dim,), hidden_dim),
        # output: nn.Linear(hidden_dim, vocab_size)
        "out_w": u(ks[6], (vocab_size, hidden_dim), hidden_dim),
        "out_b": u(ks[7], (vocab_size,), hidden_dim),
    }


def decoder_reference(z, params, sequence_length):
    """Pure-JAX f32 reference mirroring torch semantics."""
    H = params["lh_w"].shape[0]
    h0 = z @ params["lh_w"].T + params["lh_b"]
    x_proj = h0 @ params["w_ih"].T + params["b_ih"] + params["b_hh"]
    B = z.shape[0]
    h = jnp.zeros((B, H), jnp.float32)
    c = jnp.zeros((B, H), jnp.float32)
    outs = []
    for _ in range(sequence_length):
        gates = x_proj + h @ params["w_hh"].T
        i_g = jax.nn.sigmoid(gates[:, 0 * H:1 * H])
        f_g = jax.nn.sigmoid(gates[:, 1 * H:2 * H])
        g_g = jnp.tanh(gates[:, 2 * H:3 * H])
        o_g = jax.nn.sigmoid(gates[:, 3 * H:4 * H])
        c = f_g * c + i_g * g_g
        h = o_g * jnp.tanh(c)
        outs.append(h @ params["out_w"].T + params["out_b"])
    return jnp.stack(outs, axis=1)


def decoder_reference_mirror(z, prep, sequence_length):
    """Reference mirroring the kernel's fused-gate / bf16-matmul numerics."""
    H = prep["hidden_dim"]
    bf16, f32 = jnp.bfloat16, jnp.float32
    B = z.shape[0]
    h0 = jnp.dot(z.astype(bf16), prep["w1"], preferred_element_type=f32) + prep["b1"]
    x_proj = jnp.dot(h0.astype(bf16), prep["wih"],
                     preferred_element_type=f32) + prep["bg"]
    h = jnp.zeros((B, H), f32)
    c = jnp.zeros((B, H), f32)
    outs = []
    for _ in range(sequence_length):
        gates = x_proj + jnp.dot(h.astype(bf16), prep["whh"],
                                 preferred_element_type=f32)
        s = jax.nn.sigmoid(gates[:, :3 * H])
        g = jnp.tanh(gates[:, 3 * H:])
        i_g, f_g, o_g = s[:, :H], s[:, H:2 * H], s[:, 2 * H:3 * H]
        c = f_g * c + i_g * g
        h = o_g * jnp.tanh(c)
        outs.append(jnp.dot(h.astype(bf16), prep["wout"],
                            preferred_element_type=f32) + prep["bout"])
    out = jnp.stack(outs, axis=1)
    return out[:, :, :prep["vocab_size"]]


if __name__ == "__main__":
    # Small shapes consistent with the module's forward.
    batch = 2
    vocab_size = 64
    hidden_dim = 32
    latent_dim = 8
    sequence_length = 8

    key = jax.random.PRNGKey(0)
    k_z, k_p = jax.random.split(key)
    z = jax.random.normal(k_z, (batch, latent_dim), jnp.float32)
    params = init_params(k_p, vocab_size, hidden_dim, latent_dim)
    prep = prepare_params(params)

    # time_chunk=4 -> exercises the chunked (multi grid-step) recurrence path.
    logits = decoder_forward(z, prep, sequence_length, time_chunk=4)
    logits = jax.block_until_ready(logits)
    assert logits.shape == (batch, sequence_length, vocab_size)
    logits_f32 = logits.astype(jnp.float32)

    # Tight check vs a reference with identical bf16-matmul / fused-gate numerics
    # (slack only for the final bf16 output cast).
    ref_mirror = decoder_reference_mirror(z, prep, sequence_length)
    assert jnp.allclose(logits_f32, ref_mirror, atol=2e-2, rtol=2e-2), \
        float(jnp.max(jnp.abs(logits_f32 - ref_mirror)))

    # Looser check vs the full-f32 torch-semantics reference (bf16 weight drift).
    ref_f32 = decoder_reference(z, params, sequence_length)
    assert jnp.allclose(logits_f32, ref_f32, atol=7e-2, rtol=7e-2), \
        float(jnp.max(jnp.abs(logits_f32 - ref_f32)))

    print("KERNEL_OK")
</pallas_src>

<mosaic_0001>
module attributes {stable_mosaic.version = 11 : i64} {
  func.func @_decoder_kernel(%arg0: i32, %arg1: i32, %arg2: memref<16x8xf32, #tpu.memory_space<vmem>>, %arg3: memref<8x32xbf16, #tpu.memory_space<vmem>>, %arg4: memref<1x32xf32, #tpu.memory_space<vmem>>, %arg5: memref<32x128xbf16, #tpu.memory_space<vmem>>, %arg6: memref<32x128xbf16, #tpu.memory_space<vmem>>, %arg7: memref<1x128xf32, #tpu.memory_space<vmem>>, %arg8: memref<32x128xbf16, #tpu.memory_space<vmem>>, %arg9: memref<1x128xf32, #tpu.memory_space<vmem>>, %arg10: memref<16x512xbf16, #tpu.memory_space<vmem>>, %arg11: memref<16x32xf32, #tpu.memory_space<vmem>>, %arg12: memref<16x32xf32, #tpu.memory_space<vmem>>, %arg13: memref<64x32xbf16, #tpu.memory_space<vmem>>) attributes {dimension_semantics = [#tpu.dimension_semantics<parallel>, #tpu.dimension_semantics<arbitrary>], iteration_bounds = array<i64: 1, 2>, scalar_prefetch = 0 : i64, scratch_operands = 3 : i64, tpu.core_type = #tpu.core_type<tc>, window_params = [{transform_indices = @transform_0, window_bounds = array<i64: 16, 8>}, {pipeline_mode = #tpu.pipeline_mode<synchronous>, transform_indices = @transform_1, window_bounds = array<i64: 8, 32>}, {pipeline_mode = #tpu.pipeline_mode<synchronous>, transform_indices = @transform_2, window_bounds = array<i64: 1, 32>}, {pipeline_mode = #tpu.pipeline_mode<synchronous>, transform_indices = @transform_3, window_bounds = array<i64: 32, 128>}, {pipeline_mode = #tpu.pipeline_mode<synchronous>, transform_indices = @transform_4, window_bounds = array<i64: 32, 128>}, {pipeline_mode = #tpu.pipeline_mode<synchronous>, transform_indices = @transform_5, window_bounds = array<i64: 1, 128>}, {pipeline_mode = #tpu.pipeline_mode<synchronous>, transform_indices = @transform_6, window_bounds = array<i64: 32, 128>}, {pipeline_mode = #tpu.pipeline_mode<synchronous>, transform_indices = @transform_7, window_bounds = array<i64: 1, 128>}, {transform_indices = @transform_8, window_bounds = array<i64: 16, 512>}]} {
    %c0_i32 = arith.constant 0 : i32
    %0 = arith.cmpi eq, %arg1, %c0_i32 : i32
    %1 = arith.extui %0 : i1 to i32
    %c0_i32_0 = arith.constant 0 : i32
    %2 = arith.cmpi ne, %1, %c0_i32_0 : i32
    scf.if %2 {
      %cst_49 = arith.constant 0.000000e+00 : f32
      %132 = vector.broadcast %cst_49 : f32 to vector<16x32xf32>
      %c0_50 = arith.constant 0 : index
      %c0_51 = arith.constant 0 : index
      %133 = vector.load %arg11[%c0_50, %c0_51] : memref<16x32xf32, #tpu.memory_space<vmem>>, vector<16x32xf32>
      tpu.vector_store %arg11[%c0_50, %c0_51], %132 {strides = array<i32>} : memref<16x32xf32, #tpu.memory_space<vmem>>, vector<16x32xf32>,
      %cst_52 = arith.constant 0.000000e+00 : f32
      %134 = vector.broadcast %cst_52 : f32 to vector<16x32xf32>
      %c0_53 = arith.constant 0 : index
      %c0_54 = arith.constant 0 : index
      %135 = vector.load %arg12[%c0_53, %c0_54] : memref<16x32xf32, #tpu.memory_space<vmem>>, vector<16x32xf32>
      tpu.vector_store %arg12[%c0_53, %c0_54], %134 {strides = array<i32>} : memref<16x32xf32, #tpu.memory_space<vmem>>, vector<16x32xf32>,
    } else {
    }
    %c0 = arith.constant 0 : index
    %c0_1 = arith.constant 0 : index
    %3 = vector.load %arg2[%c0, %c0_1] : memref<16x8xf32, #tpu.memory_space<vmem>>, vector<16x8xf32>
    %4 = arith.truncf %3 : vector<16x8xf32> to vector<16x8xbf16>
    %c0_2 = arith.constant 0 : index
    %c0_3 = arith.constant 0 : index
    %5 = vector.load %arg3[%c0_2, %c0_3] : memref<8x32xbf16, #tpu.memory_space<vmem>>, vector<8x32xbf16>
    %cst = arith.constant dense<0.000000e+00> : vector<16x32xf32>
    %6 = tpu.matmul %4, %5, %cst {dimension_numbers = #tpu.dot_dimension_numbers<[1], [0], [0], [1], [0, 0, 1, 1], [], []>} : vector<16x8xbf16>, vector<8x32xbf16>, vector<16x32xf32> -> vector<16x32xf32>
    %c0_4 = arith.constant 0 : index
    %c0_5 = arith.constant 0 : index
    %7 = vector.load %arg4[%c0_4, %c0_5] : memref<1x32xf32, #tpu.memory_space<vmem>>, vector<1x32xf32>
    %8 = vector.broadcast %7 : vector<1x32xf32> to vector<16x32xf32>
    %9 = arith.addf %6, %8 : vector<16x32xf32>
    %10 = arith.truncf %9 : vector<16x32xf32> to vector<16x32xbf16>
    %c0_6 = arith.constant 0 : index
    %c0_7 = arith.constant 0 : index
    %11 = vector.load %arg5[%c0_6, %c0_7] : memref<32x128xbf16, #tpu.memory_space<vmem>>, vector<32x128xbf16>
    %cst_8 = arith.constant dense<0.000000e+00> : vector<16x128xf32>
    %12 = tpu.matmul %10, %11, %cst_8 {dimension_numbers = #tpu.dot_dimension_numbers<[1], [0], [0], [1], [0, 0, 1, 1], [], []>} : vector<16x32xbf16>, vector<32x128xbf16>, vector<16x128xf32> -> vector<16x128xf32>
    %c0_9 = arith.constant 0 : index
    %c0_10 = arith.constant 0 : index
    %13 = vector.load %arg7[%c0_9, %c0_10] : memref<1x128xf32, #tpu.memory_space<vmem>>, vector<1x128xf32>
    %14 = vector.broadcast %13 : vector<1x128xf32> to vector<16x128xf32>
    %15 = arith.addf %12, %14 : vector<16x128xf32>
    %c0_11 = arith.constant 0 : index
    %c0_12 = arith.constant 0 : index
    %16 = vector.load %arg6[%c0_11, %c0_12] : memref<32x128xbf16, #tpu.memory_space<vmem>>, vector<32x128xbf16>
    %c0_13 = arith.constant 0 : index
    %c0_14 = arith.constant 0 : index
    %17 = vector.load %arg11[%c0_13, %c0_14] : memref<16x32xf32, #tpu.memory_space<vmem>>, vector<16x32xf32>
    %c0_15 = arith.constant 0 : index
    %c0_16 = arith.constant 0 : index
    %18 = vector.load %arg12[%c0_15, %c0_16] : memref<16x32xf32, #tpu.memory_space<vmem>>, vector<16x32xf32>
    %c0_i32_17 = arith.constant 0 : i32
    %19 = arith.truncf %17 : vector<16x32xf32> to vector<16x32xbf16>
    %cst_18 = arith.constant dense<0.000000e+00> : vector<16x128xf32>
    %20 = tpu.matmul %19, %16, %cst_18 {dimension_numbers = #tpu.dot_dimension_numbers<[1], [0], [0], [1], [0, 0, 1, 1], [], []>} : vector<16x32xbf16>, vector<32x128xbf16>, vector<16x128xf32> -> vector<16x128xf32>
    %21 = arith.addf %15, %20 : vector<16x128xf32>
    %22 = vector.extract_strided_slice %21 {offsets = [0, 0], sizes = [16, 96], strides = [1, 1]} : vector<16x128xf32> to vector<16x96xf32>
    %23 = arith.negf %22 : vector<16x96xf32>
    %24 = math.exp %23 : vector<16x96xf32>
    %cst_19 = arith.constant 1.000000e+00 : f32
    %25 = vector.broadcast %cst_19 : f32 to vector<16x96xf32>
    %26 = arith.addf %25, %24 : vector<16x96xf32>
    %27 = arith.divf %25, %26 : vector<16x96xf32>
    %28 = vector.extract_strided_slice %21 {offsets = [0, 96], sizes = [16, 32], strides = [1, 1]} : vector<16x128xf32> to vector<16x32xf32>
    %29 = math.tanh %28 : vector<16x32xf32>
    %30 = vector.extract_strided_slice %27 {offsets = [0, 0], sizes = [16, 32], strides = [1, 1]} : vector<16x96xf32> to vector<16x32xf32>
    %31 = vector.extract_strided_slice %27 {offsets = [0, 32], sizes = [16, 32], strides = [1, 1]} : vector<16x96xf32> to vector<16x32xf32>
    %32 = vector.extract_strided_slice %27 {offsets = [0, 64], sizes = [16, 32], strides = [1, 1]} : vector<16x96xf32> to vector<16x32xf32>
    %33 = arith.mulf %31, %18 : vector<16x32xf32>
    %34 = arith.mulf %30, %29 : vector<16x32xf32>
    %35 = arith.addf %33, %34 : vector<16x32xf32>
    %36 = math.tanh %35 : vector<16x32xf32>
    %37 = arith.mulf %32, %36 : vector<16x32xf32>
    %c16_i32 = arith.constant 16 : i32
    %38 = arith.muli %c0_i32_17, %c16_i32 : i32
    %39 = tpu.assume_multiple %38, 16 : i32
    %40 = arith.truncf %37 : vector<16x32xf32> to vector<16x32xbf16>
    %41 = arith.index_cast %39 : i32 to index
    %c0_20 = arith.constant 0 : index
    %42 = vector.load %arg13[%41, %c0_20] : memref<64x32xbf16, #tpu.memory_space<vmem>>, vector<16x32xbf16>
    tpu.vector_store %arg13[%41, %c0_20], %40 {strides = array<i32>} : memref<64x32xbf16, #tpu.memory_space<vmem>>, vector<16x32xbf16>,
    %c1_i32 = arith.constant 1 : i32
    %43 = arith.truncf %37 : vector<16x32xf32> to vector<16x32xbf16>
    %cst_21 = arith.constant dense<0.000000e+00> : vector<16x128xf32>
    %44 = tpu.matmul %43, %16, %cst_21 {dimension_numbers = #tpu.dot_dimension_numbers<[1], [0], [0], [1], [0, 0, 1, 1], [], []>} : vector<16x32xbf16>, vector<32x128xbf16>, vector<16x128xf32> -> vector<16x128xf32>
    %45 = arith.addf %15, %44 : vector<16x128xf32>
    %46 = vector.extract_strided_slice %45 {offsets = [0, 0], sizes = [16, 96], strides = [1, 1]} : vector<16x128xf32> to vector<16x96xf32>
    %47 = arith.negf %46 : vector<16x96xf32>
    %48 = math.exp %47 : vector<16x96xf32>
    %cst_22 = arith.constant 1.000000e+00 : f32
    %49 = vector.broadcast %cst_22 : f32 to vector<16x96xf32>
    %50 = arith.addf %49, %48 : vector<16x96xf32>
    %51 = arith.divf %49, %50 : vector<16x96xf32>
    %52 = vector.extract_strided_slice %45 {offsets = [0, 96], sizes = [16, 32], strides = [1, 1]} : vector<16x128xf32> to vector<16x32xf32>
    %53 = math.tanh %52 : vector<16x32xf32>
    %54 = vector.extract_strided_slice %51 {offsets = [0, 0], sizes = [16, 32], strides = [1, 1]} : vector<16x96xf32> to vector<16x32xf32>
    %55 = vector.extract_strided_slice %51 {offsets = [0, 32], sizes = [16, 32], strides = [1, 1]} : vector<16x96xf32> to vector<16x32xf32>
    %56 = vector.extract_strided_slice %51 {offsets = [0, 64], sizes = [16, 32], strides = [1, 1]} : vector<16x96xf32> to vector<16x32xf32>
    %57 = arith.mulf %55, %35 : vector<16x32xf32>
    %58 = arith.mulf %54, %53 : vector<16x32xf32>
    %59 = arith.addf %57, %58 : vector<16x32xf32>
    %60 = math.tanh %59 : vector<16x32xf32>
    %61 = arith.mulf %56, %60 : vector<16x32xf32>
    %c16_i32_23 = arith.constant 16 : i32
    %62 = arith.muli %c1_i32, %c16_i32_23 : i32
    %63 = tpu.assume_multiple %62, 16 : i32
    %64 = arith.truncf %61 : vector<16x32xf32> to vector<16x32xbf16>
    %65 = arith.index_cast %63 : i32 to index
    %c0_24 = arith.constant 0 : index
    %66 = vector.load %arg13[%65, %c0_24] : memref<64x32xbf16, #tpu.memory_space<vmem>>, vector<16x32xbf16>
    tpu.vector_store %arg13[%65, %c0_24], %64 {strides = array<i32>} : memref<64x32xbf16, #tpu.memory_space<vmem>>, vector<16x32xbf16>,
    %c2_i32 = arith.constant 2 : i32
    %67 = arith.truncf %61 : vector<16x32xf32> to vector<16x32xbf16>
    %cst_25 = arith.constant dense<0.000000e+00> : vector<16x128xf32>
    %68 = tpu.matmul %67, %16, %cst_25 {dimension_numbers = #tpu.dot_dimension_numbers<[1], [0], [0], [1], [0, 0, 1, 1], [], []>} : vector<16x32xbf16>, vector<32x128xbf16>, vector<16x128xf32> -> vector<16x128xf32>
    %69 = arith.addf %15, %68 : vector<16x128xf32>
    %70 = vector.extract_strided_slice %69 {offsets = [0, 0], sizes = [16, 96], strides = [1, 1]} : vector<16x128xf32> to vector<16x96xf32>
    %71 = arith.negf %70 : vector<16x96xf32>
    %72 = math.exp %71 : vector<16x96xf32>
    %cst_26 = arith.constant 1.000000e+00 : f32
    %73 = vector.broadcast %cst_26 : f32 to vector<16x96xf32>
    %74 = arith.addf %73, %72 : vector<16x96xf32>
    %75 = arith.divf %73, %74 : vector<16x96xf32>
    %76 = vector.extract_strided_slice %69 {offsets = [0, 96], sizes = [16, 32], strides = [1, 1]} : vector<16x128xf32> to vector<16x32xf32>
    %77 = math.tanh %76 : vector<16x32xf32>
    %78 = vector.extract_strided_slice %75 {offsets = [0, 0], sizes = [16, 32], strides = [1, 1]} : vector<16x96xf32> to vector<16x32xf32>
    %79 = vector.extract_strided_slice %75 {offsets = [0, 32], sizes = [16, 32], strides = [1, 1]} : vector<16x96xf32> to vector<16x32xf32>
    %80 = vector.extract_strided_slice %75 {offsets = [0, 64], sizes = [16, 32], strides = [1, 1]} : vector<16x96xf32> to vector<16x32xf32>
    %81 = arith.mulf %79, %59 : vector<16x32xf32>
    %82 = arith.mulf %78, %77 : vector<16x32xf32>
    %83 = arith.addf %81, %82 : vector<16x32xf32>
    %84 = math.tanh %83 : vector<16x32xf32>
    %85 = arith.mulf %80, %84 : vector<16x32xf32>
    %c16_i32_27 = arith.constant 16 : i32
    %86 = arith.muli %c2_i32, %c16_i32_27 : i32
    %87 = tpu.assume_multiple %86, 16 : i32
    %88 = arith.truncf %85 : vector<16x32xf32> to vector<16x32xbf16>
    %89 = arith.index_cast %87 : i32 to index
    %c0_28 = arith.constant 0 : index
    %90 = vector.load %arg13[%89, %c0_28] : memref<64x32xbf16, #tpu.memory_space<vmem>>, vector<16x32xbf16>
    tpu.vector_store %arg13[%89, %c0_28], %88 {strides = array<i32>} : memref<64x32xbf16, #tpu.memory_space<vmem>>, vector<16x32xbf16>,
    %c3_i32 = arith.constant 3 : i32
    %91 = arith.truncf %85 : vector<16x32xf32> to vector<16x32xbf16>
    %cst_29 = arith.constant dense<0.000000e+00> : vector<16x128xf32>
    %92 = tpu.matmul %91, %16, %cst_29 {dimension_numbers = #tpu.dot_dimension_numbers<[1], [0], [0], [1], [0, 0, 1, 1], [], []>} : vector<16x32xbf16>, vector<32x128xbf16>, vector<16x128xf32> -> vector<16x128xf32>
    %93 = arith.addf %15, %92 : vector<16x128xf32>
    %94 = vector.extract_strided_slice %93 {offsets = [0, 0], sizes = [16, 96], strides = [1, 1]} : vector<16x128xf32> to vector<16x96xf32>
    %95 = arith.negf %94 : vector<16x96xf32>
    %96 = math.exp %95 : vector<16x96xf32>
    %cst_30 = arith.constant 1.000000e+00 : f32
    %97 = vector.broadcast %cst_30 : f32 to vector<16x96xf32>
    %98 = arith.addf %97, %96 : vector<16x96xf32>
    %99 = arith.divf %97, %98 : vector<16x96xf32>
    %100 = vector.extract_strided_slice %93 {offsets = [0, 96], sizes = [16, 32], strides = [1, 1]} : vector<16x128xf32> to vector<16x32xf32>
    %101 = math.tanh %100 : vector<16x32xf32>
    %102 = vector.extract_strided_slice %99 {offsets = [0, 0], sizes = [16, 32], strides = [1, 1]} : vector<16x96xf32> to vector<16x32xf32>
    %103 = vector.extract_strided_slice %99 {offsets = [0, 32], sizes = [16, 32], strides = [1, 1]} : vector<16x96xf32> to vector<16x32xf32>
    %104 = vector.extract_strided_slice %99 {offsets = [0, 64], sizes = [16, 32], strides = [1, 1]} : vector<16x96xf32> to vector<16x32xf32>
    %105 = arith.mulf %103, %83 : vector<16x32xf32>
    %106 = arith.mulf %102, %101 : vector<16x32xf32>
    %107 = arith.addf %105, %106 : vector<16x32xf32>
    %108 = math.tanh %107 : vector<16x32xf32>
    %109 = arith.mulf %104, %108 : vector<16x32xf32>
    %c16_i32_31 = arith.constant 16 : i32
    %110 = arith.muli %c3_i32, %c16_i32_31 : i32
    %111 = tpu.assume_multiple %110, 16 : i32
    %112 = arith.truncf %109 : vector<16x32xf32> to vector<16x32xbf16>
    %113 = arith.index_cast %111 : i32 to index
    %c0_32 = arith.constant 0 : index
    %114 = vector.load %arg13[%113, %c0_32] : memref<64x32xbf16, #tpu.memory_space<vmem>>, vector<16x32xbf16>
    tpu.vector_store %arg13[%113, %c0_32], %112 {strides = array<i32>} : memref<64x32xbf16, #tpu.memory_space<vmem>>, vector<16x32xbf16>,
    %c4_i32 = arith.constant 4 : i32
    %c0_33 = arith.constant 0 : index
    %c0_34 = arith.constant 0 : index
    %115 = vector.load %arg11[%c0_33, %c0_34] : memref<16x32xf32, #tpu.memory_space<vmem>>, vector<16x32xf32>
    tpu.vector_store %arg11[%c0_33, %c0_34], %109 {strides = array<i32>} : memref<16x32xf32, #tpu.memory_space<vmem>>, vector<16x32xf32>,
    %c0_35 = arith.constant 0 : index
    %c0_36 = arith.constant 0 : index
    %116 = vector.load %arg12[%c0_35, %c0_36] : memref<16x32xf32, #tpu.memory_space<vmem>>, vector<16x32xf32>
    tpu.vector_store %arg12[%c0_35, %c0_36], %107 {strides = array<i32>} : memref<16x32xf32, #tpu.memory_space<vmem>>, vector<16x32xf32>,
    %c0_37 = arith.constant 0 : index
    %c0_38 = arith.constant 0 : index
    %117 = vector.load %arg13[%c0_37, %c0_38] : memref<64x32xbf16, #tpu.memory_space<vmem>>, vector<64x32xbf16>
    %c0_39 = arith.constant 0 : index
    %c0_40 = arith.constant 0 : index
    %118 = vector.load %arg8[%c0_39, %c0_40] : memref<32x128xbf16, #tpu.memory_space<vmem>>, vector<32x128xbf16>
    %cst_41 = arith.constant dense<0.000000e+00> : vector<64x128xf32>
    %119 = tpu.matmul %117, %118, %cst_41 {dimension_numbers = #tpu.dot_dimension_numbers<[1], [0], [0], [1], [0, 0, 1, 1], [], []>} : vector<64x32xbf16>, vector<32x128xbf16>, vector<64x128xf32> -> vector<64x128xf32>
    %c0_42 = arith.constant 0 : index
    %c0_43 = arith.constant 0 : index
    %120 = vector.load %arg9[%c0_42, %c0_43] : memref<1x128xf32, #tpu.memory_space<vmem>>, vector<1x128xf32>
    %121 = vector.broadcast %120 : vector<1x128xf32> to vector<64x128xf32>
    %122 = arith.addf %119, %121 : vector<64x128xf32>
    %123 = arith.truncf %122 : vector<64x128xf32> to vector<64x128xbf16>
    %124 = vector.extract_strided_slice %123 {offsets = [0, 0], sizes = [16, 128], strides = [1, 1]} : vector<64x128xbf16> to vector<16x128xbf16>
    %c0_44 = arith.constant 0 : index
    %c0_45 = arith.constant 0 : index
    %125 = vector.load %arg10[%c0_44, %c0_45] : memref<16x512xbf16, #tpu.memory_space<vmem>>, vector<16x128xbf16>
    tpu.vector_store %arg10[%c0_44, %c0_45], %124 {strides = array<i32>} : memref<16x512xbf16, #tpu.memory_space<vmem>>, vector<16x128xbf16>,
    %126 = vector.extract_strided_slice %123 {offsets = [16, 0], sizes = [16, 128], strides = [1, 1]} : vector<64x128xbf16> to vector<16x128xbf16>
    %c0_46 = arith.constant 0 : index
    %c128 = arith.constant 128 : index
    %127 = vector.load %arg10[%c0_46, %c128] : memref<16x512xbf16, #tpu.memory_space<vmem>>, vector<16x128xbf16>
    tpu.vector_store %arg10[%c0_46, %c128], %126 {strides = array<i32>} : memref<16x512xbf16, #tpu.memory_space<vmem>>, vector<16x128xbf16>,
    %128 = vector.extract_strided_slice %123 {offsets = [32, 0], sizes = [16, 128], strides = [1, 1]} : vector<64x128xbf16> to vector<16x128xbf16>
    %c0_47 = arith.constant 0 : index
    %c256 = arith.constant 256 : index
    %129 = vector.load %arg10[%c0_47, %c256] : memref<16x512xbf16, #tpu.memory_space<vmem>>, vector<16x128xbf16>
    tpu.vector_store %arg10[%c0_47, %c256], %128 {strides = array<i32>} : memref<16x512xbf16, #tpu.memory_space<vmem>>, vector<16x128xbf16>,
    %130 = vector.extract_strided_slice %123 {offsets = [48, 0], sizes = [16, 128], strides = [1, 1]} : vector<64x128xbf16> to vector<16x128xbf16>
    %c0_48 = arith.constant 0 : index
    %c384 = arith.constant 384 : index
    %131 = vector.load %arg10[%c0_48, %c384] : memref<16x512xbf16, #tpu.memory_space<vmem>>, vector<16x128xbf16>
    tpu.vector_store %arg10[%c0_48, %c384], %130 {strides = array<i32>} : memref<16x512xbf16, #tpu.memory_space<vmem>>, vector<16x128xbf16>,
    return
  }
  func.func @transform_0(%arg0: i32, %arg1: i32) -> (i32, i32) {
    %c0_i32 = arith.constant 0 : i32
    %c0_i32_0 = arith.constant 0 : i32
    return %arg0, %c0_i32 : i32, i32
  }
  func.func @transform_1(%arg0: i32, %arg1: i32) -> (i32, i32) {
    %c0_i32 = arith.constant 0 : i32
    %c0_i32_0 = arith.constant 0 : i32
    %c0_i32_1 = arith.constant 0 : i32
    return %c0_i32, %c0_i32_0 : i32, i32
  }
  func.func @transform_2(%arg0: i32, %arg1: i32) -> (i32, i32) {
    %c0_i32 = arith.constant 0 : i32
    %c0_i32_0 = arith.constant 0 : i32
    %c0_i32_1 = arith.constant 0 : i32
    return %c0_i32, %c0_i32_0 : i32, i32
  }
  func.func @transform_3(%arg0: i32, %arg1: i32) -> (i32, i32) {
    %c0_i32 = arith.constant 0 : i32
    %c0_i32_0 = arith.constant 0 : i32
    %c0_i32_1 = arith.constant 0 : i32
    return %c0_i32, %c0_i32_0 : i32, i32
  }
  func.func @transform_4(%arg0: i32, %arg1: i32) -> (i32, i32) {
    %c0_i32 = arith.constant 0 : i32
    %c0_i32_0 = arith.constant 0 : i32
    %c0_i32_1 = arith.constant 0 : i32
    return %c0_i32, %c0_i32_0 : i32, i32
  }
  func.func @transform_5(%arg0: i32, %arg1: i32) -> (i32, i32) {
    %c0_i32 = arith.constant 0 : i32
    %c0_i32_0 = arith.constant 0 : i32
    %c0_i32_1 = arith.constant 0 : i32
    return %c0_i32, %c0_i32_0 : i32, i32
  }
  func.func @transform_6(%arg0: i32, %arg1: i32) -> (i32, i32) {
    %c0_i32 = arith.constant 0 : i32
    %c0_i32_0 = arith.constant 0 : i32
    %c0_i32_1 = arith.constant 0 : i32
    return %c0_i32, %c0_i32_0 : i32, i32
  }
  func.func @transform_7(%arg0: i32, %arg1: i32) -> (i32, i32) {
    %c0_i32 = arith.constant 0 : i32
    %c0_i32_0 = arith.constant 0 : i32
    %c0_i32_1 = arith.constant 0 : i32
    return %c0_i32, %c0_i32_0 : i32, i32
  }
  func.func @transform_8(%arg0: i32, %arg1: i32) -> (i32, i32) {
    %c0_i32 = arith.constant 0 : i32
    return %arg0, %arg1 : i32, i32
  }
}

</mosaic_0001>

<bundles_post_ra>
// kernel: tpu_custom_call.1
= control target key start
LH: loop header
LB: loop body
LE: loop exit
PB: predicated region body
PF: predicated region fallthrough
CT: control target
= control target key end

     0   :  { %s2537_s0 = inlined_call_operand.hbm [shape: f32[16,8], index: 0, kind: input, shape index: {}]   ;;  %s2538_s1 = inlined_call_operand.hbm [shape: bf16[8,32], index: 1, kind: input, shape index: {}]   ;;  %s2539_s2 = inlined_call_operand.hbm [shape: f32[1,32], index: 2, kind: input, shape index: {}]   ;;  %s2540_s3 = inlined_call_operand.hbm [shape: bf16[32,128], index: 3, kind: input, shape index: {}]   ;;  %s2541_s4 = inlined_call_operand.hbm [shape: bf16[32,128], index: 4, kind: input, shape index: {}]   ;;  %s2542_s5 = inlined_call_operand.hbm [shape: f32[1,128], index: 5, kind: input, shape index: {}]   ;;  %s2543_s6 = inlined_call_operand.hbm [shape: bf16[32,128], index: 6, kind: input, shape index: {}]   ;;  %s2544_s7 = inlined_call_operand.hbm [shape: f32[1,128], index: 7, kind: input, shape index: {}]   ;;  %s2545_s8 = inlined_call_operand.hbm [shape: bf16[16,1024], index: 8, kind: output, shape index: {}]  }
   0x1   :  { %2558 = sst [smem:[#allocation31_spill]] %s2538_s1 }
   0x2   :  { %2559 = sst [smem:[#allocation32_spill]] %s2540_s3 }
   0x3   :  { %2560 = sst [smem:[#allocation33_spill]] %s2542_s5 }
   0x4   :  { %13 = vsyncpa [#allocation6], 0 }
   0x5   :  { %14 = vsyncpa [#allocation9], 0 }
   0x6   :  { %15 = vsyncpa [#allocation12], 0 }
   0x7   :  { %16 = vsyncpa [#allocation15], 0 }
   0x8   :  { %17 = vsyncpa [#allocation18], 0 }
   0x9   :  { %18 = vsyncpa [#allocation7], 0 }
   0xa   :  { %20 = vsyncpa [#allocation7 + $0x1], 0  ;;  %s2097_s27 = smov 0   ;;  %s2099_s28 = smov 0  }
   0xb   :  { %s2101_s29 = smov 0   ;;  %s2103_s30 = smov 0  }
   0xc   :  { %s2105_s9 = smov 0   ;;  %s2107_s10 = smov 0  }
   0xd LB: > { %2561 = sst [smem:[#allocation26_spill]] %s2016_s29  ;;  %s1312_s11 = sadd.s32 4294967295, %s2028_s10   ;;  %s2028_s10 = sphi %s2107_s10, %s26_s10   ;;  %s2024_s9 = sphi %s2105_s9, %s2585_s9   ;;  %s2020_s30 = sphi %s2103_s30, %s2584_s30   ;;  %s2016_s29 = sphi %s2101_s29, %s2583_s29   ;;  %s2012_s28 = sphi %s2099_s28, %s2587_s28   ;;  %s2008_s27 = sphi %s2097_s27, %s2586_s27  }
   0xe   : > { %2562 = sst [smem:[#allocation27_spill]] %s2024_s9  ;;  %s1313_s12 = sadd.s32 4294967294, %s2028_s10  }
   0xf   : > { %s35_s13 = sadd.s32 1, %s2024_s9  ;;  %s220_s14 = sadd.s32 1, %s2016_s29 }
  0x10   : > { %p36_p0 = scmp.ge.s32.totalorder %s35_s13, 2  ;;  %p230_p1 = scmp.ne.s32.totalorder %s2016_s29, %s2012_s28 }
  0x11   : > { %p231_p2 = scmp.eq.s32.totalorder %s1312_s11, 1  ;;  %p236_p3 = scmp.ne.s32.totalorder %s2012_s28, %s2008_s27 }
  0x12   : > { %s2589_s13 = smov (%p36_p0, %s35_s13), 0  ;;  %p237_p5 = scmp.eq.s32.totalorder %s1313_s12, 1 }
  0x13   : > { %2563 = sst [smem:[#allocation28_spill]] %s2589_s13  ;;  %p2137_p4 = por %p231_p2, %p230_p1 }
  0x14   : > { %s216_s16 = ssub.s32 %s2024_s9, %s2589_s13  ;;  %p1314_p6 = scmp.ge.s32.totalorder %s2028_s10, 1 }
  0x15   : > { %s2564_s15 = scalar_select %p2137_p4, 1, 0 }
  0x16   : > { %p218_p7 = scmp.eq.s32.totalorder %s216_s16, 0  ;;  %p2144_p8 = por %p237_p5, %p236_p3 }
  0x17   : > { %p244_p9 = scmp.lt.s32.totalorder %s2028_s10, 3  ;;  %p2156_p11 = scmp.eq.s32.totalorder %s1312_s11, 0 }
  0x18   : > { %s2565_s17 = scalar_select %p2144_p8, 1, 0 }
  0x19   : > { %s2150_s18 = scalar_select %p218_p7, %s2016_s29, %s220_s14  }
  0x1a   : > { %2566 = sst [smem:[#allocation29_spill]] %s2565_s17  ;;  %p2152_p10 = pnand %p1314_p6, %p244_p9 }
  0x1b   : > { %2567 = sst [smem:[#allocation30_spill]] %s2150_s18  ;;  %s2030_s21 = smov [#allocation8]  }
  0x1c   : > { %s2568_s19 = scalar_select %p2152_p10, 1, 0 }
  0x1d   : > { %s2569_s20 = scalar_select %p2156_p11, 1, 0 }
  0x1e   : > { %p1521_p12 = pneg %p2152_p10  ;;  %s273_s22 = sshll.u32 %s2030_s21, 4  ;;  %s274_s22 = int_to_ptr.vmem [resolvable:$true] %s273_s22 }
  0x1f   : > { %s2031_s23 = smov [#allocation11]   ;;  %s2571_s1 = sld [smem:[#allocation31_spill]] }
  0x20   : > { %s294_s24 = sshll.u32 %s2031_s23, 4  ;;  %p2164_p13 = pnand %p2156_p11, %p1521_p12  ;;  %s2168_s24 = int_to_ptr.vmem [resolvable:$true] %s294_s24 }
  0x22   : > { %p2178_p1 = pneg %p2164_p13 }
  0x25   : > { %s1706_s12 = scalar_lea.hbm %s2571_s1, 64 }
  0x26   : > { %p1707_p0 = scmp.ne.s32.totalorder %s2571_s1, %s1706_s12  ;;  %p1713_p5 = scmp.lt.u32.totalorder %s1706_s12, %s2571_s1 }
  0x28   : > { %p1709_p2 = pnand %p2178_p1, %p1707_p0 }
  0x2a   : > { %p1710_p3 = pneg %p1709_p2 }
  0x2c   : > { %p1715_p6 = pnand %p1713_p5, %p1710_p3 }
  0x2e   : > { %1718 = shalt.err (!%p1715_p6)
}
  0x2f   : > { %s1719_s26 = scalar_lea.vmem %s274_s22, 64  ;;  %p1727_p8 = scmp.lt.s32.totalorder %s274_s22, %s274_s22 }
  0x30   : > { %p1720_p7 = scmp.ne.s32.totalorder %s274_s22, %s1719_s26  ;;  %p1728_p4 = scmp.lt.s32.totalorder %s1719_s26, %s1719_s26 }
  0x32   : > { %p1722_p9 = pnand %p1720_p7, %p2178_p1  ;;  %p1729_p11 = por %p1728_p4, %p1727_p8 }
  0x34   : > { %p1723_p12 = pneg %p1722_p9 }
  0x36   : > { %p1730_p10 = pnand %p1729_p11, %p1723_p12 }
  0x38   : > { %1733 = shalt.err (!%p1730_p10)
}
  0x39   : > { %1527 = dma.hbm_to_vmem [thread:$0]  (!%p2164_p13), %s2571_s1, 64, %s274_s22, [#allocation9]  }
  0x3a   : > { %s2573_s3 = sld [smem:[#allocation32_spill]] }
  0x40   : > { %s1734_s16 = scalar_lea.hbm %s2573_s3, 256 }
  0x41   : > { %p1735_p0 = scmp.ne.s32.totalorder %s2573_s3, %s1734_s16  ;;  %p1741_p8 = scmp.lt.u32.totalorder %s1734_s16, %s2573_s3 }
  0x43   : > { %p1737_p2 = pnand %p1735_p0, %p2178_p1 }
  0x45   : > { %p1738_p4 = pneg %p1737_p2 }
  0x47   : > { %p1743_p10 = pnand %p1741_p8, %p1738_p4 }
  0x49   : > { %1746 = shalt.err (!%p1743_p10)
}
  0x4a   : > { %s1747_s22 = scalar_lea.vmem %s2168_s24, 256  ;;  %p1755_p6 = scmp.lt.s32.totalorder %s2168_s24, %s2168_s24 }
  0x4b   : > { %p1748_p11 = scmp.ne.s32.totalorder %s2168_s24, %s1747_s22  ;;  %p1756_p7 = scmp.lt.s32.totalorder %s1747_s22, %s1747_s22 }
  0x4d   : > { %p1750_p3 = pnand %p1748_p11, %p2178_p1  ;;  %p1757_p9 = por %p1756_p7, %p1755_p6 }
  0x4f   : > { %p1751_p5 = pneg %p1750_p3 }
  0x51   : > { %p1758_p12 = pnand %p1757_p9, %p1751_p5 }
  0x53   : > { %1761 = shalt.err (!%p1758_p12)
}
  0x54   : > { %s2554_s9 = smov 64   ;;  %s2556_s18 = smov 4  }
  0x55   : > { %1533 = dma.hbm_to_vmem [thread:$0]  (!%p2164_p13), %s2573_s3, 256, %s2168_s24, [#allocation12], %s2554_s9, %s2554_s9, %s2556_s18  }
  0x56   : > { %s2034_s13 = smov [#allocation14]   ;;  %s2574_s5 = sld [smem:[#allocation33_spill]] }
  0x57   : > { %s321_s12 = sshll.u32 %s2034_s13, 4  ;;  %s322_s12 = int_to_ptr.vmem [resolvable:$true] %s321_s12 }
  0x5c   : > { %s1762_s26 = scalar_lea.hbm %s2574_s5, 16 }
  0x5d   : > { %p1763_p0 = scmp.ne.s32.totalorder %s2574_s5, %s1762_s26  ;;  %p1769_p8 = scmp.lt.u32.totalorder %s1762_s26, %s2574_s5 }
  0x5f   : > { %p1765_p2 = pnand %p1763_p0, %p2178_p1 }
  0x61   : > { %p1766_p4 = pneg %p1765_p2 }
  0x63   : > { %p1771_p10 = pnand %p1769_p8, %p1766_p4 }
  0x65   : > { %1774 = shalt.err (!%p1771_p10)
}
  0x66   : > { %s1775_s24 = scalar_lea.vmem %s322_s12, 16  ;;  %s1782_s11 = scalar_lea.vmem %s322_s12, 32 }
  0x67   : > { %p1776_p11 = scmp.ne.s32.totalorder %s322_s12, %s1775_s24  ;;  %p1783_p6 = scmp.lt.s32.totalorder %s322_s12, %s322_s12 }
  0x68   : > { %p1784_p7 = scmp.lt.s32.totalorder %s1782_s11, %s1775_s24 }
  0x69   : > { %p1778_p3 = pnand %p1776_p11, %p2178_p1 }
  0x6a   : > { %p1785_p9 = por %p1784_p7, %p1783_p6 }
  0x6b   : > { %p1779_p5 = pneg %p1778_p3 }
  0x6d   : > { %p1786_p12 = pnand %p1785_p9, %p1779_p5 }
  0x6f   : > { %1789 = shalt.err (!%p1786_p12)
}
  0x70   : > { %1539 = dma.hbm_to_vmem [thread:$0]  (!%p2164_p13), %s2574_s5, 16, %s322_s12, [#allocation15]  }
  0x71   : > { %s2035_s29 = smov [#allocation5]   ;;  %s1790_s23 = scalar_lea.hbm %s2537_s0, 256 }
  0x72   : > { %s259_s17 = sshll.u32 %s2035_s29, 4  ;;  %p1791_p0 = scmp.ne.s32.totalorder %s2537_s0, %s1790_s23  ;;  %s260_s17 = int_to_ptr.vmem [resolvable:$true] %s259_s17 }
  0x73   : > { %p1797_p8 = scmp.lt.u32.totalorder %s1790_s23, %s2537_s0 }
  0x74   : > { %p1793_p2 = pnand %p1791_p0, %p2178_p1 }
  0x76   : > { %p1794_p4 = pneg %p1793_p2 }
  0x78   : > { %p1799_p10 = pnand %p1797_p8, %p1794_p4 }
  0x7a   : > { %1802 = shalt.err (!%p1799_p10)
}
  0x7b   : > { %s1803_s12 = scalar_lea.vmem %s260_s17, 256  ;;  %p1811_p6 = scmp.lt.s32.totalorder %s260_s17, %s260_s17 }
  0x7c   : > { %p1804_p11 = scmp.ne.s32.totalorder %s260_s17, %s1803_s12  ;;  %p1812_p7 = scmp.lt.s32.totalorder %s1803_s12, %s1803_s12 }
  0x7e   : > { %p1806_p3 = pnand %p1804_p11, %p2178_p1  ;;  %p1813_p9 = por %p1812_p7, %p1811_p6 }
  0x80   : > { %p1807_p5 = pneg %p1806_p3 }
  0x82   : > { %p1814_p12 = pnand %p1813_p9, %p1807_p5 }
  0x84   : > { %1817 = shalt.err (!%p1814_p12)
}
  0x85   : > { %s2036_s1 = smov 128   ;;  %s2037_s14 = smov 8  }
  0x86   : > { %1524 = dma.hbm_to_vmem [thread:$0]  (!%p2164_p13), %s2537_s0, 256, %s260_s17, [#allocation6], %s2036_s1, %s2036_s1, %s2037_s14  }
  0x87   : > { %s2038_s16 = smov [#allocation10]   ;;  %s2039_s26 = smov [#allocation13]  }
  0x88   : > { %s284_s23 = sshll.u32 %s2038_s16, 4  ;;  %s307_s22 = sshll.u32 %s2039_s26, 4  ;;  %s285_s23 = int_to_ptr.vmem [resolvable:$true] %s284_s23  ;;  %s308_s22 = int_to_ptr.vmem [resolvable:$true] %s307_s22 }
  0x89   : > { %s1818_s12 = scalar_lea.hbm %s2539_s2, 16 }
  0x8a   : > { %p1819_p0 = scmp.ne.s32.totalorder %s2539_s2, %s1818_s12  ;;  %p1825_p8 = scmp.lt.u32.totalorder %s1818_s12, %s2539_s2 }
  0x8c   : > { %p1821_p2 = pnand %p1819_p0, %p2178_p1 }
  0x8e   : > { %p1822_p4 = pneg %p1821_p2 }
  0x90   : > { %p1827_p10 = pnand %p1825_p8, %p1822_p4 }
  0x92   : > { %1830 = shalt.err (!%p1827_p10)
}
  0x93   : > { %s1831_s17 = scalar_lea.vmem %s285_s23, 16  ;;  %s1838_s1 = scalar_lea.vmem %s285_s23, 32 }
  0x94   : > { %p1832_p11 = scmp.ne.s32.totalorder %s285_s23, %s1831_s17  ;;  %p1839_p6 = scmp.lt.s32.totalorder %s285_s23, %s285_s23 }
  0x95   : > { %p1840_p7 = scmp.lt.s32.totalorder %s1838_s1, %s1831_s17 }
  0x96   : > { %p1834_p3 = pnand %p1832_p11, %p2178_p1 }
  0x97   : > { %p1841_p9 = por %p1840_p7, %p1839_p6 }
  0x98   : > { %p1835_p5 = pneg %p1834_p3 }
  0x9a   : > { %p1842_p12 = pnand %p1841_p9, %p1835_p5 }
  0x9c   : > { %1845 = shalt.err (!%p1842_p12)
}
  0x9d   : > { %1530 = dma.hbm_to_vmem [thread:$0]  (!%p2164_p13), %s2539_s2, 16, %s285_s23, [#allocation9]  }
  0x9e   : > { %s1846_s14 = scalar_lea.hbm %s2541_s4, 256 }
  0x9f   : > { %p1847_p0 = scmp.ne.s32.totalorder %s2541_s4, %s1846_s14  ;;  %p1853_p8 = scmp.lt.u32.totalorder %s1846_s14, %s2541_s4 }
  0xa1   : > { %p1849_p2 = pnand %p1847_p0, %p2178_p1 }
  0xa3   : > { %p1850_p4 = pneg %p1849_p2 }
  0xa5   : > { %p1855_p10 = pnand %p1853_p8, %p1850_p4 }
  0xa7   : > { %1858 = shalt.err (!%p1855_p10)
}
  0xa8   : > { %s1859_s24 = scalar_lea.vmem %s308_s22, 256  ;;  %p1867_p6 = scmp.lt.s32.totalorder %s308_s22, %s308_s22 }
  0xa9   : > { %p1860_p11 = scmp.ne.s32.totalorder %s308_s22, %s1859_s24  ;;  %p1868_p7 = scmp.lt.s32.totalorder %s1859_s24, %s1859_s24 }
  0xab   : > { %p1862_p3 = pnand %p1860_p11, %p2178_p1  ;;  %p1869_p9 = por %p1868_p7, %p1867_p6 }
  0xad   : > { %p1863_p5 = pneg %p1862_p3 }
  0xaf   : > { %p1870_p12 = pnand %p1869_p9, %p1863_p5 }
  0xb1   : > { %1873 = shalt.err (!%p1870_p12)
}
  0xb2   : > { %s2575_s23 = smov 4   ;;  %s2576_s11 = smov 64  }
  0xb3   : > { %1536 = dma.hbm_to_vmem [thread:$0]  (!%p2164_p13), %s2541_s4, 256, %s308_s22, [#allocation12], %s2576_s11, %s2576_s11, %s2575_s23  }
  0xb4   : > { %s2040_s1 = smov [#allocation16]   ;;  %s2041_s18 = smov [#allocation17]  }
  0xb5   : > { %s331_s9 = sshll.u32 %s2040_s1, 4  ;;  %s345_s3 = sshll.u32 %s2041_s18, 4  ;;  %s332_s9 = int_to_ptr.vmem [resolvable:$true] %s331_s9  ;;  %s346_s3 = int_to_ptr.vmem [resolvable:$true] %s345_s3 }
  0xb6   : > { %s1874_s29 = scalar_lea.hbm %s2543_s6, 256 }
  0xb7   : > { %p1875_p0 = scmp.ne.s32.totalorder %s2543_s6, %s1874_s29  ;;  %p1881_p8 = scmp.lt.u32.totalorder %s1874_s29, %s2543_s6 }
  0xb9   : > { %p1877_p2 = pnand %p1875_p0, %p2178_p1 }
  0xbb   : > { %p1878_p4 = pneg %p1877_p2 }
  0xbd   : > { %p1883_p10 = pnand %p1881_p8, %p1878_p4 }
  0xbf   : > { %1886 = shalt.err (!%p1883_p10)
}
  0xc0   : > { %s1887_s22 = scalar_lea.vmem %s332_s9, 256  ;;  %p1895_p6 = scmp.lt.s32.totalorder %s332_s9, %s332_s9 }
  0xc1   : > { %p1888_p11 = scmp.ne.s32.totalorder %s332_s9, %s1887_s22  ;;  %p1896_p7 = scmp.lt.s32.totalorder %s1887_s22, %s1887_s22 }
  0xc3   : > { %p1890_p3 = pnand %p1888_p11, %p2178_p1  ;;  %p1897_p9 = por %p1896_p7, %p1895_p6 }
  0xc5   : > { %p1891_p5 = pneg %p1890_p3 }
  0xc7   : > { %p1898_p12 = pnand %p1897_p9, %p1891_p5 }
  0xc9   : > { %1901 = shalt.err (!%p1898_p12)
}
  0xca   : > { %1542 = dma.hbm_to_vmem [thread:$0]  (!%p2164_p13), %s2543_s6, 256, %s332_s9, [#allocation15], %s2576_s11, %s2576_s11, %s2575_s23  }
  0xcb   : > { %s1902_s5 = scalar_lea.hbm %s2544_s7, 16 }
  0xcc   : > { %p1903_p0 = scmp.ne.s32.totalorder %s2544_s7, %s1902_s5  ;;  %p1909_p8 = scmp.lt.u32.totalorder %s1902_s5, %s2544_s7 }
  0xce   : > { %p1905_p2 = pnand %p1903_p0, %p2178_p1 }
  0xd0   : > { %p1906_p4 = pneg %p1905_p2 }
  0xd2   : > { %p1911_p10 = pnand %p1909_p8, %p1906_p4 }
  0xd4   : > { %1914 = shalt.err (!%p1911_p10)
}
  0xd5   : > { %s1915_s26 = scalar_lea.vmem %s346_s3, 16  ;;  %s1922_s23 = scalar_lea.vmem %s346_s3, 32 }
  0xd6   : > { %p1916_p11 = scmp.ne.s32.totalorder %s346_s3, %s1915_s26  ;;  %p1923_p6 = scmp.lt.s32.totalorder %s346_s3, %s346_s3 }
  0xd7   : > { %p1924_p7 = scmp.lt.s32.totalorder %s1922_s23, %s1915_s26 }
  0xd8   : > { %p1918_p3 = pnand %p1916_p11, %p2178_p1 }
  0xd9   : > { %p1925_p9 = por %p1924_p7, %p1923_p6 }
  0xda   : > { %p1919_p5 = pneg %p1918_p3 }
  0xdc   : > { %p1926_p12 = pnand %p1925_p9, %p1919_p5 }
  0xde   : > { %1929 = shalt.err (!%p1926_p12)
}
  0xdf   : > { %1545 = dma.hbm_to_vmem [thread:$0]  (!%p2164_p13), %s2544_s7, 16, %s346_s3, [#allocation18]  }
  0xe0   : > { %p2577_p0 = scmp.ne.s32.totalorder %s2568_s19, 0 }
  0xe1   : > { %p2578_p2 = scmp.ne.s32.totalorder (!%p2577_p0), %s2569_s20, 0 }
  0xe2   : > { %358 = sbr.rel (%p2577_p0) target bundleno = 3545 (0xdd9), region = 52 }
  0xe9   : > { %1983 = dma.done.wait (%p2578_p2), [#allocation6], 256  }
  0xea   : > { %1985 = vsyncadd (%p2578_p2), [#allocation6], 4294967040 }
  0xeb   : > { %1987 = dma.done.wait (%p2578_p2), [#allocation9], 80  }
  0xec   : > { %1989 = vsyncadd (%p2578_p2), [#allocation9], 4294967216 }
  0xed   : > { %1991 = dma.done.wait (%p2578_p2), [#allocation12], 512  }
  0xee   : > { %1993 = vsyncadd (%p2578_p2), [#allocation12], 4294966784 }
  0xef   : > { %1995 = dma.done.wait (%p2578_p2), [#allocation15], 272  }
  0xf0   : > { %1997 = vsyncadd (%p2578_p2), [#allocation15], 4294967024 }
  0xf1   : > { %1999 = dma.done.wait (%p2578_p2), [#allocation18], 16  }
  0xf2   : > { %2001 = vsyncadd (%p2578_p2), [#allocation18], 4294967280  ;;  %s412_s19 = sand.u32 1, %s2012_s28   ;;  %p1333_p13 = scmp.ne.s32.totalorder %s2020_s30, 0 }
  0xf3   : > { %s1332_s25 = sshll.u32 %s412_s19, 5  ;;  %vm423_vm0 = vcmask (!%p1333_p13), 261120   ;;  %v2042_v0 = vmov (!%p1333_p13), 0.0  }
  0xf4   : > { %s2359_s21 = scalar_lea.vmem [#allocation19], %s1332_s25  ;;  %422 = sbr.rel (%p1333_p13) target bundleno = 251 (0xfb), region = 88  ;;  %424 = vst.msk [vmem:[#allocation2] sm:$0xff] (!%p1333_p13), %vm423_vm0, %v2042_v0  ;;  %425 = vst.msk [vmem:[#allocation2 + $0x8] sm:$0xff] (!%p1333_p13), %vm423_vm0, %v2042_v0 }
  0xf5   : > { %426 = vst.msk [vmem:[#allocation3] sm:$0xff] (!%p1333_p13), %vm423_vm0, %v2042_v0  ;;  %427 = vst.msk [vmem:[#allocation3 + $0x8] sm:$0xff] (!%p1333_p13), %vm423_vm0, %v2042_v0 }
  0xfb PF: > { %v431_v1 = vld [vmem:[#allocation8] sm:$0xf]  ;;  %vm443_vm1 = vcmask 1043456   ;;  %v428_v2 = vld [vmem:[#allocation5] sm:$0xff]  ;;  %v2043_v3 = vmov 0.0   ;;  %vm2044_vm2 = vmmov 0  }
  0xfc   : > { %1429 = vmatprep.subr.bf16.mxu1 %v2043_v3  ;;  %v445_v4 = vsel %vm443_vm1, %v431_v1, 0  ;;  %1431 = vmatprep.mubr.msk.bf16.mxu1 %vm2044_vm2, %v2043_v3  ;;  %v429_v5 = vld [vmem:[#allocation5 + $0x8] sm:$0xff]  ;;  %vm439_vm3 = vcmask 64512   ;;  %v1636_v6 = vld [vmem:[#allocation11] sm:$0xff]   ;;  %v1638_v10 = vld [vmem:[#allocation11 + $0x8] sm:$0xff]   ;;  %vm512_vm4 = vcmask 261120  }
  0xfd   : > { %1430 = vmatpush3.bf16.msra.mxu1 %v445_v4  ;;  %v430_v7 = vpack.c.bf16 %v429_v5, %v428_v2  ;;  %1443 = vmatprep.subr.bf16.mxu0 %v2043_v3  ;;  %v2367_v8 = vld [vmem:[#allocation13] sm:$0xff]   ;;  %v2376_v9 = vld [vmem:[#allocation13 + $0x8] sm:$0xff]   ;;  %s2045_s20 = smov 32   ;;  %v564_v15 = vld [vmem:[#allocation3 + $0x8] sm:$0xff]  ;;  %s2046_s3 = smov 64  }
  0xfe   : > { %1435 = vmatprep.subr.bf16.mxu1 %v2043_v3  ;;  %1447 = vmatprep.mubr.msk.bf16.mxu0 %vm2044_vm2, %v2043_v3  ;;  %v561_v11 = vld [vmem:[#allocation2] sm:$0xff]  ;;  %v562_v12 = vld [vmem:[#allocation2 + $0x8] sm:$0xff]  ;;  %v563_v14 = vld [vmem:[#allocation3] sm:$0xff]  ;;  %s2047_s24 = smov 96   ;;  %s1382_s22 = sshll.u32 %s2020_s30, 8 }
  0xff   : > { %1444 = vmatpush3.bf16.msra.mxu0 %v2367_v8  ;;  %v565_v13 = vpack.c.bf16 %v562_v12, %v561_v11  ;;  %640 = vrot.lane.b32.xlu1 %v563_v14, %s2045_s20  ;;  %v1334_v16 = vld [vmem:[#allocation10] ss:$0 sm:$0xff]  ;;  %v1336_v28 = vld [vmem:[#allocation14] ss:$0 sm:$0xff]  ;;  %s1170_s12 = sshll.u32 %s2359_s21, 4  ;;  %s2483_s18 = scalar_lea.hbm %s2545_s8, %s1382_s22  ;;  %s2485_s12 = int_to_ptr.vmem [resolvable:$true] %s1170_s12 }
 0x100   : > { %1432 = vmatmul.mubr.msk.bf16.vlgmr.msra.gmra.mrb[0].mxu1 %vm439_vm3, %v430_v7  ;;  %1445 = vmatprep.subr.bf16.mxu0 %v2043_v3  ;;  %s2491_s30 = scalar_lea.sflag [#allocation7], %s412_s19  ;;  %s1930_s5 = scalar_lea.vmem %s2485_s12, 512 }
 0x101   : > { %1436 = vmatpush3.bf16.msra.mxu1 %v1636_v6  ;;  %1439 = vmatprep.mubr.msk.bf16.mxu1 %vm2044_vm2, %v2043_v3  ;;  %p1931_p1 = scmp.ne.s32.totalorder %s2485_s12, %s1930_s5  ;;  %p2579_p4 = scmp.ne.s32.totalorder %s2564_s15, 0 }
 0x102   : > { %1437 = vmatprep.subr.bf16.mxu1 %v2043_v3  ;;  %s2048_s14 = smov [#allocation19]  }
 0x103   : > { %1446 = vmatpush3.bf16.msra.mxu0 %v2376_v9  ;;  %642 = vrot.lane.b32.xlu1 %v564_v15, %s2045_s20  ;;  %p1932_p8 = pnand %p1931_p1, %p2579_p4  ;;  %s1934_s29 = sshll.u32 %s2048_s14, 4  ;;  %s1935_s29 = int_to_ptr.vmem [resolvable:$false] %s1934_s29 }
 0x104   : > { %1459 = vmatprep.subr.bf16.mxu0 %v2043_v3  ;;  %s1936_s13 = scalar_lea.vmem %s1935_s29, 1024  ;;  %p1937_p11 = scmp.lt.s32.totalorder %s2485_s12, %s1935_s29 }
 0x105   : > { %1438 = vmatpush3.bf16.msra.mxu1 %v1638_v10  ;;  %p1933_p10 = pneg %p1932_p8  ;;  %p1938_p3 = scmp.lt.s32.totalorder %s1936_s13, %s1930_s5 }
 0x106   : > { %1451 = vmatprep.subr.bf16.mxu1 %v2043_v3  ;;  %1448 = vmatmul.mubr.msk.bf16.vlgmr.msra.gmra.mrb[0].mxu0 %vm512_vm4, %v565_v13 }
 0x107   : > { %1460 = vmatpush3.bf16.msra.mxu0 %v2367_v8  ;;  %1463 = vmatprep.mubr.msk.bf16.mxu0 %vm2044_vm2, %v2043_v3  ;;  %p1939_p5 = por %p1938_p3, %p1937_p11 }
 0x108   : > { %1461 = vmatprep.subr.bf16.mxu0 %v2043_v3 }
 0x109   : > { %p1940_p6 = pnand %p1939_p5, %p1933_p10 }
 0x10b   : > { %1462 = vmatpush3.bf16.msra.mxu0 %v2376_v9 }
 0x171   : > { %v641_v51 = vpop.permute.xlu1 %640 }
 0x175   : > { %v643_v53 = vpop.permute.xlu1 %642 }
 0x1d3   : > { %v481_v17 = vpop.f32.mrb[0].mxu1 }
 0x1d4   : > { %v1433_v18 = vpop.f32.mrb[1].mxu1  ;;  %v482_v20 = vadd.f32 %v1334_v16, %v481_v17 }
 0x1d5   : > { %v484_v19 = vpop.f32.mrb[2].mxu1 }
 0x1d6   : > { %v485_v21 = vadd.f32 %v1334_v16, %v484_v19  ;;  %v1434_v22 = vpop.f32.mrb[3].mxu1 }
 0x1d8   : > { %v488_v23 = vpack.c.bf16 %v485_v21, %v482_v20 }
 0x1d9   : > { %v615_v24 = vpop.f32.mrb[0].mxu0 }
 0x1da   : > { %1440 = vmatmul.mubr.msk.bf16.vlgmr.msra.gmra.mrb[4].mxu1 %vm512_vm4, %v488_v23  ;;  %v1449_v25 = vpop.f32.mrb[1].mxu0 }
 0x1db   : > { %1452 = vmatpush3.bf16.msra.mxu1 %v2367_v8  ;;  %1455 = vmatprep.mubr.msk.bf16.mxu1 %vm2044_vm2, %v2043_v3  ;;  %v618_v26 = vpop.f32.mrb[2].mxu0 }
 0x1dc   : > { %1453 = vmatprep.subr.bf16.mxu1 %v2043_v3  ;;  %v1450_v27 = vpop.f32.mrb[3].mxu0 }
 0x1df   : > { %1454 = vmatpush3.bf16.msra.mxu1 %v2376_v9 }
 0x1e0   : > { %1467 = vmatprep.subr.bf16.mxu1 %v2043_v3 }
 0x2ad   : > { %v550_v29 = vpop.f32.mrb[4].mxu1 }
 0x2ae   : > { %v2396_v30 = vadd.f32 %v1336_v28, %v550_v29  ;;  %v1441_v31 = vpop.f32.mrb[5].mxu1 }
 0x2af   : > { %v553_v32 = vpop.f32.mrb[6].mxu1 }
 0x2b0   : > { %v622_v33 = vadd.f32 %v615_v24, %v2396_v30  ;;  %v2399_v34 = vadd.f32 %v1336_v28, %v553_v32  ;;  %v1442_v35 = vpop.f32.mrb[7].mxu1  ;;  %v1640_v32 = vld [vmem:[#allocation16] sm:$0xff]  }
 0x2b1   : > { %1475 = vmatprep.subr.bf16.mxu0 %v1640_v32 }
 0x2b2   : > { %v623_v36 = vadd.f32 %v618_v26, %v2399_v34  ;;  %1642 = vtanh.f32 %v622_v33  ;;  %v1343_v39 = vmul.f32 -1.442695, %v622_v33 }
 0x2b4   : > { %1644 = vtanh.f32 %v623_v36  ;;  %v1344_v40 = vmul.f32 -1.442695, %v623_v36 }
 0x2b5   : > { %1646 = vpow2.f32 %v1343_v39  ;;  %v1641_v39 = vld [vmem:[#allocation16 + $0x8] sm:$0xff]  }
 0x2b6   : > { %1648 = vpow2.f32 %v1344_v40 }
 0x2bc   : > { %v1643_v37 = vpop.eup %1642 }
 0x2bd   : > { %650 = vrot.lane.b32.xlu0 %v1643_v37, %s2045_s20 }
 0x2be   : > { %v1645_v38 = vpop.eup %1644 }
 0x2bf   : > { %v1647_v41 = vpop.eup %1646 }
 0x2c0   : > { %v630_v42 = vadd.f32 1.0, %v1647_v41  ;;  %v1649_v43 = vpop.eup %1648 }
 0x2c1   : > { %652 = vrot.lane.b32.xlu0 %v1645_v38, %s2045_s20  ;;  %v631_v44 = vadd.f32 1.0, %v1649_v43 }
 0x2c2   : > { %1650 = vrcp.f32 %v630_v42 }
 0x2c3   : > { %1652 = vrcp.f32 %v631_v44 }
 0x2cc   : > { %v1651_v45 = vpop.eup %1650 }
 0x2cd   : > { %v1653_v48 = vpop.eup %1652  ;;  %v646_v52 = vmul.f32 %v1651_v45, %v641_v51 }
 0x2ce   : > { %v647_v56 = vmul.f32 %v1653_v48, %v643_v53 }
 0x32f   : > { %v651_v46 = vpop.permute.xlu0 %650 }
 0x330   : > { %v656_v47 = vmul.f32 %v1651_v45, %v651_v46 }
 0x332   : > { %660 = vrot.lane.b32.xlu0 %v656_v47, %s2045_s20 }
 0x333   : > { %v653_v49 = vpop.permute.xlu0 %652 }
 0x334   : > { %v657_v50 = vmul.f32 %v1653_v48, %v653_v49  ;;  %v2437_v49 = vld [vmem:[#allocation17] ss:$0 sm:$0xff] }
 0x336   : > { %662 = vrot.lane.b32.xlu1 %v657_v50, %s2045_s20 }
 0x3a4   : > { %v661_v54 = vpop.permute.xlu0 %660 }
 0x3a5   : > { %v666_v55 = vadd.f32 %v661_v54, %v646_v52 }
 0x3a7   : > { %1654 = vtanh.f32 %v666_v55 }
 0x3a8   : > { %v663_v57 = vpop.permute.xlu1 %662 }
 0x3a9   : > { %v667_v58 = vadd.f32 %v663_v57, %v647_v56 }
 0x3ab   : > { %1656 = vtanh.f32 %v667_v58 }
 0x3b1   : > { %v1655_v59 = vpop.eup %1654 }
 0x3b2   : > { %672 = vrot.lane.b32.xlu0 %v1655_v59, %s2045_s20 }
 0x3b5   : > { %v1657_v60 = vpop.eup %1656 }
 0x3b6   : > { %674 = vrot.lane.b32.xlu1 %v1657_v60, %s2045_s20 }
 0x424   : > { %v673_v61 = vpop.permute.xlu0 %672 }
 0x425   : > { %v678_v63 = vmul.f32 %v1651_v45, %v673_v61 }
 0x428   : > { %v675_v62 = vpop.permute.xlu1 %674 }
 0x429   : > { %v679_v0 = vmul.f32 %v1653_v48, %v675_v62 }
 0x42b   : > { %v680_v1 = vpack.c.bf16 %v679_v0, %v678_v63 }
 0x42d   : > { %682 = vrot.lane.b32.xlu0 %v680_v1, %s2046_s3 }
 0x49f   : > { %v683_v2 = vpop.permute.xlu0 %682 }
 0x4a0   : > { %685 = vst.msk [vmem:[#allocation4] sm:$0xff] %vm512_vm4, %v683_v2  ;;  %1456 = vmatmul.mubr.msk.bf16.vlgmr.msra.gmra.mrb[8].mxu1 %vm512_vm4, %v683_v2 }
 0x4a1   : > { %1468 = vmatpush3.bf16.msra.mxu1 %v2367_v8  ;;  %1471 = vmatprep.mubr.msk.bf16.mxu1 %vm2044_vm2, %v2043_v3 }
 0x4a2   : > { %1469 = vmatprep.subr.bf16.mxu1 %v2043_v3 }
 0x4a5   : > { %1470 = vmatpush3.bf16.msra.mxu1 %v2376_v9 }
 0x4a7   : > { %v1009_v41 = vld [vmem:[#allocation4] sm:$0xff] }
 0x573   : > { %v723_v4 = vpop.f32.mrb[8].mxu1 }
 0x574   : > { %v730_v5 = vadd.f32 %v723_v4, %v2396_v30  ;;  %v1457_v6 = vpop.f32.mrb[9].mxu1 }
 0x575   : > { %v726_v7 = vpop.f32.mrb[10].mxu1 }
 0x576   : > { %1658 = vtanh.f32 %v730_v5  ;;  %v731_v10 = vadd.f32 %v726_v7, %v2399_v34  ;;  %v1458_v11 = vpop.f32.mrb[11].mxu1  ;;  %v1346_v13 = vmul.f32 -1.442695, %v730_v5 }
 0x578   : > { %1660 = vtanh.f32 %v731_v10  ;;  %v1347_v3 = vmul.f32 -1.442695, %v731_v10 }
 0x579   : > { %1662 = vpow2.f32 %v1346_v13 }
 0x57a   : > { %1664 = vpow2.f32 %v1347_v3 }
 0x580   : > { %v1659_v12 = vpop.eup %1658 }
 0x581   : > { %750 = vrot.lane.b32.xlu1 %v1659_v12, %s2045_s20 }
 0x582   : > { %v1661_v8 = vpop.eup %1660 }
 0x583   : > { %752 = vrot.lane.b32.xlu0 %v1661_v8, %s2045_s20  ;;  %v1663_v9 = vpop.eup %1662 }
 0x584   : > { %v1665_v14 = vpop.eup %1664  ;;  %v738_v15 = vadd.f32 1.0, %v1663_v9 }
 0x585   : > { %v739_v16 = vadd.f32 1.0, %v1665_v14 }
 0x586   : > { %1666 = vrcp.f32 %v738_v15 }
 0x587   : > { %1668 = vrcp.f32 %v739_v16 }
 0x590   : > { %v1667_v17 = vpop.eup %1666 }
 0x591   : > { %v1669_v20 = vpop.eup %1668  ;;  %v746_v23 = vmul.f32 %v1667_v17, %v666_v55 }
 0x592   : > { %v747_v26 = vmul.f32 %v1669_v20, %v667_v58 }
 0x5f3   : > { %v751_v18 = vpop.permute.xlu1 %750 }
 0x5f4   : > { %v756_v19 = vmul.f32 %v1667_v17, %v751_v18 }
 0x5f5   : > { %v753_v21 = vpop.permute.xlu0 %752 }
 0x5f6   : > { %760 = vrot.lane.b32.xlu1 %v756_v19, %s2045_s20  ;;  %v757_v22 = vmul.f32 %v1669_v20, %v753_v21 }
 0x5f8   : > { %762 = vrot.lane.b32.xlu0 %v757_v22, %s2045_s20 }
 0x668   : > { %v761_v24 = vpop.permute.xlu1 %760 }
 0x669   : > { %v2422_v25 = vadd.f32 %v761_v24, %v746_v23 }
 0x66a   : > { %v763_v27 = vpop.permute.xlu0 %762 }
 0x66b   : > { %1670 = vtanh.f32 %v2422_v25  ;;  %v2425_v28 = vadd.f32 %v763_v27, %v747_v26 }
 0x66d   : > { %1672 = vtanh.f32 %v2425_v28 }
 0x675   : > { %v1671_v29 = vpop.eup %1670 }
 0x676   : > { %772 = vrot.lane.b32.xlu1 %v1671_v29, %s2045_s20 }
 0x677   : > { %v1673_v31 = vpop.eup %1672 }
 0x678   : > { %774 = vrot.lane.b32.xlu0 %v1673_v31, %s2045_s20 }
 0x6e8   : > { %v773_v33 = vpop.permute.xlu1 %772 }
 0x6e9   : > { %v778_v36 = vmul.f32 %v1667_v17, %v773_v33 }
 0x6ea   : > { %v775_v35 = vpop.permute.xlu0 %774 }
 0x6eb   : > { %v779_v37 = vmul.f32 %v1669_v20, %v775_v35 }
 0x6ed   : > { %v780_v38 = vpack.c.bf16 %v779_v37, %v778_v36 }
 0x6ef   : > { %782 = vrot.lane.b32.xlu1 %v780_v38, %s2046_s3 }
 0x761   : > { %v783_v40 = vpop.permute.xlu1 %782 }
 0x762   : > { %786 = vst.msk [vmem:[#allocation4 + $0x8] sm:$0xff] %vm512_vm4, %v783_v40  ;;  %1464 = vmatmul.mubr.msk.bf16.vlgmr.msra.gmra.mrb[4].mxu0 %vm512_vm4, %v783_v40 }
 0x763   : > { %1476 = vmatpush3.bf16.msra.mxu0 %v1640_v32  ;;  %1479 = vmatprep.mubr.msk.bf16.mxu0 %vm512_vm4, %v1009_v41 }
 0x764   : > { %1477 = vmatprep.subr.bf16.mxu0 %v1641_v39 }
 0x767   : > { %1478 = vmatpush3.bf16.msra.mxu0 %v1641_v39 }
 0x769   : > { %v1010_v42 = vld [vmem:[#allocation4 + $0x8] sm:$0xff] }
 0x76a   : > { %1480 = vmatmul.mubr.msk.bf16.vlgmr.msra.gmra.mrb[8].mxu0 %vm512_vm4, %v1010_v42 }
 0x835   : > { %v824_v43 = vpop.f32.mrb[4].mxu0 }
 0x836   : > { %v831_v44 = vadd.f32 %v824_v43, %v2396_v30  ;;  %v1465_v45 = vpop.f32.mrb[5].mxu0 }
 0x837   : > { %v827_v46 = vpop.f32.mrb[6].mxu0 }
 0x838   : > { %1674 = vtanh.f32 %v831_v44  ;;  %v832_v47 = vadd.f32 %v827_v46, %v2399_v34  ;;  %v1466_v48 = vpop.f32.mrb[7].mxu0  ;;  %v1349_v62 = vmul.f32 -1.442695, %v831_v44 }
 0x83a   : > { %1676 = vtanh.f32 %v832_v47  ;;  %v1350_v63 = vmul.f32 -1.442695, %v832_v47 }
 0x83b   : > { %1678 = vpow2.f32 %v1349_v62 }
 0x83c   : > { %1680 = vpow2.f32 %v1350_v63 }
 0x83d   : > { %v1481_v50 = vpop.f32.mrb[8].mxu0 }
 0x83e   : > { %v1091_v51 = vadd.f32 %v1481_v50, %v2437_v49  ;;  %v1082_v52 = vpop.f32.mrb[9].mxu0 }
 0x83f   : > { %v1083_v53 = vadd.f32 %v2437_v49, %v1082_v52  ;;  %v1482_v54 = vpop.f32.mrb[10].mxu0 }
 0x840   : > { %v1094_v55 = vadd.f32 %v1482_v54, %v2437_v49  ;;  %v1085_v56 = vpop.f32.mrb[11].mxu0 }
 0x841   : > { %v1386_v57 = vpack.c.bf16 %v1091_v51, %v1083_v53  ;;  %v1086_v58 = vadd.f32 %v2437_v49, %v1085_v56 }
 0x842   : > { %v1675_v59 = vpop.eup %1674 }
 0x843   : > { %1387 = vst [vmem:[%s2359_s21] sm:$0xff] %v1386_v57   ;;  %v1391_v60 = vpack.c.bf16 %v1094_v55, %v1086_v58  ;;  %851 = vrot.lane.b32.xlu0 %v1675_v59, %s2045_s20 }
 0x844   : > { %v1677_v61 = vpop.eup %1676 }
 0x845   : > { %1403 = vst [vmem:[%s2359_s21 + $0x10] sm:$0xff] %v1391_v60   ;;  %853 = vrot.lane.b32.xlu1 %v1677_v61, %s2045_s20  ;;  %v1679_v0 = vpop.eup %1678 }
 0x846   : > { %v1681_v1 = vpop.eup %1680  ;;  %v839_v2 = vadd.f32 1.0, %v1679_v0 }
 0x847   : > { %v840_v4 = vadd.f32 1.0, %v1681_v1 }
 0x848   : > { %1682 = vrcp.f32 %v839_v2 }
 0x849   : > { %1684 = vrcp.f32 %v840_v4 }
 0x852   : > { %v1683_v5 = vpop.eup %1682 }
 0x853   : > { %v1685_v10 = vpop.eup %1684  ;;  %v847_v8 = vmul.f32 %v1683_v5, %v2422_v25 }
 0x854   : > { %v848_v9 = vmul.f32 %v1685_v10, %v2425_v28 }
 0x8b5   : > { %v852_v6 = vpop.permute.xlu0 %851 }
 0x8b6   : > { %v857_v7 = vmul.f32 %v1683_v5, %v852_v6 }
 0x8b7   : > { %v854_v11 = vpop.permute.xlu1 %853 }
 0x8b8   : > { %861 = vrot.lane.b32.xlu0 %v857_v7, %s2045_s20  ;;  %v858_v12 = vmul.f32 %v1685_v10, %v854_v11 }
 0x8ba   : > { %863 = vrot.lane.b32.xlu1 %v858_v12, %s2045_s20 }
 0x92a   : > { %v862_v13 = vpop.permute.xlu0 %861 }
 0x92b   : > { %v867_v3 = vadd.f32 %v862_v13, %v847_v8 }
 0x92c   : > { %v864_v14 = vpop.permute.xlu1 %863 }
 0x92d   : > { %1686 = vtanh.f32 %v867_v3  ;;  %v868_v15 = vadd.f32 %v864_v14, %v848_v9 }
 0x92f   : > { %1688 = vtanh.f32 %v868_v15 }
 0x937   : > { %v1687_v16 = vpop.eup %1686 }
 0x938   : > { %873 = vrot.lane.b32.xlu0 %v1687_v16, %s2045_s20 }
 0x939   : > { %v1689_v17 = vpop.eup %1688 }
 0x93a   : > { %875 = vrot.lane.b32.xlu1 %v1689_v17, %s2045_s20 }
 0x9aa   : > { %v874_v18 = vpop.permute.xlu0 %873 }
 0x9ab   : > { %v879_v20 = vmul.f32 %v1683_v5, %v874_v18 }
 0x9ac   : > { %v876_v19 = vpop.permute.xlu1 %875 }
 0x9ad   : > { %v880_v21 = vmul.f32 %v1685_v10, %v876_v19 }
 0x9af   : > { %v881_v22 = vpack.c.bf16 %v880_v21, %v879_v20 }
 0x9b1   : > { %883 = vrot.lane.b32.xlu0 %v881_v22, %s2046_s3 }
 0xa23   : > { %v884_v23 = vpop.permute.xlu0 %883 }
 0xa24   : > { %887 = vst.msk [vmem:[#allocation4 + $0x10] sm:$0xff] %vm512_vm4, %v884_v23  ;;  %1472 = vmatmul.mubr.msk.bf16.vlgmr.msra.gmra.mrb[12].mxu1 %vm512_vm4, %v884_v23 }
 0xa2b   : > { %v1011_v24 = vld [vmem:[#allocation4 + $0x10] sm:$0xff] }
 0xa2c   : > { %1483 = vmatprep.mubr.msk.bf16.mxu0 %vm512_vm4, %v1011_v24 }
 0xaf7   : > { %v925_v25 = vpop.f32.mrb[12].mxu1 }
 0xaf8   : > { %v932_v26 = vadd.f32 %v925_v25, %v2396_v30  ;;  %v1473_v27 = vpop.f32.mrb[13].mxu1 }
 0xaf9   : > { %v928_v28 = vpop.f32.mrb[14].mxu1 }
 0xafa   : > { %1690 = vtanh.f32 %v932_v26  ;;  %v933_v29 = vadd.f32 %v928_v28, %v2399_v34  ;;  %v1474_v31 = vpop.f32.mrb[15].mxu1  ;;  %v1352_v35 = vmul.f32 -1.442695, %v932_v26 }
 0xafc   : > { %1692 = vtanh.f32 %v933_v29  ;;  %v1353_v36 = vmul.f32 -1.442695, %v933_v29 }
 0xafd   : > { %1694 = vpow2.f32 %v1352_v35 }
 0xafe   : > { %1696 = vpow2.f32 %v1353_v36 }
 0xb04   : > { %v1691_v32 = vpop.eup %1690 }
 0xb05   : > { %952 = vrot.lane.b32.xlu1 %v1691_v32, %s2045_s20 }
 0xb06   : > { %v1693_v33 = vpop.eup %1692 }
 0xb07   : > { %954 = vrot.lane.b32.xlu0 %v1693_v33, %s2045_s20  ;;  %v1695_v37 = vpop.eup %1694 }
 0xb08   : > { %v1697_v38 = vpop.eup %1696  ;;  %v940_v30 = vadd.f32 1.0, %v1695_v37 }
 0xb09   : > { %v941_v39 = vadd.f32 1.0, %v1697_v38 }
 0xb0a   : > { %1698 = vrcp.f32 %v940_v30 }
 0xb0b   : > { %1700 = vrcp.f32 %v941_v39 }
 0xb14   : > { %v1699_v40 = vpop.eup %1698 }
 0xb15   : > { %v1701_v42 = vpop.eup %1700  ;;  %v948_v45 = vmul.f32 %v1699_v40, %v867_v3 }
 0xb16   : > { %v949_v48 = vmul.f32 %v1701_v42, %v868_v15 }
 0xb77   : > { %v953_v34 = vpop.permute.xlu1 %952 }
 0xb78   : > { %v958_v41 = vmul.f32 %v1699_v40, %v953_v34 }
 0xb79   : > { %v955_v43 = vpop.permute.xlu0 %954 }
 0xb7a   : > { %962 = vrot.lane.b32.xlu1 %v958_v41, %s2045_s20  ;;  %v959_v44 = vmul.f32 %v1701_v42, %v955_v43 }
 0xb7c   : > { %964 = vrot.lane.b32.xlu0 %v959_v44, %s2045_s20 }
 0xbec   : > { %v963_v46 = vpop.permute.xlu1 %962 }
 0xbed   : > { %v968_v47 = vadd.f32 %v963_v46, %v948_v45 }
 0xbee   : > { %v965_v50 = vpop.permute.xlu0 %964 }
 0xbef   : > { %1702 = vtanh.f32 %v968_v47  ;;  %v969_v51 = vadd.f32 %v965_v50, %v949_v48 }
 0xbf1   : > { %1704 = vtanh.f32 %v969_v51 }
 0xbf9   : > { %v1703_v52 = vpop.eup %1702 }
 0xbfa   : > { %974 = vrot.lane.b32.xlu1 %v1703_v52, %s2045_s20 }
 0xbfb   : > { %v1705_v53 = vpop.eup %1704 }
 0xbfc   : > { %976 = vrot.lane.b32.xlu0 %v1705_v53, %s2045_s20 }
 0xc6c   : > { %v975_v54 = vpop.permute.xlu1 %974 }
 0xc6d   : > { %v980_v55 = vmul.f32 %v1699_v40, %v975_v54 }
 0xc6e   : > { %v977_v56 = vpop.permute.xlu0 %976 }
 0xc6f   : > { %991 = vrot.lane.b32.xlu0 %v980_v55, %s2046_s3  ;;  %v981_v57 = vmul.f32 %v1701_v42, %v977_v56 }
 0xc71   : > { %v982_v58 = vpack.c.bf16 %v981_v57, %v980_v55 }
 0xc73   : > { %1001 = vrot.lane.b32.xlu0 %v968_v47, %s2047_s24  ;;  %984 = vrot.lane.b32.xlu1 %v982_v58, %s2046_s3 }
 0xc77   : > { %993 = vrot.lane.b32.xlu1 %v981_v57, %s2046_s3 }
 0xc7b   : > { %1003 = vrot.lane.b32.xlu1 %v969_v51, %s2047_s24 }
 0xce1   : > { %v992_v59 = vpop.permute.xlu0 %991 }
 0xce2   : > { %997 = vst.msk [vmem:[#allocation2] sm:$0xff] %vm512_vm4, %v992_v59 }
 0xce5   : > { %v1002_v60 = vpop.permute.xlu0 %1001  ;;  %v985_v61 = vpop.permute.xlu1 %984 }
 0xce6   : > { %1007 = vst.msk [vmem:[#allocation3] sm:$0xff] %vm512_vm4, %v1002_v60  ;;  %988 = vst.msk [vmem:[#allocation4 + $0x18] sm:$0xff] %vm512_vm4, %v985_v61 }
 0xce9   : > { %v994_v62 = vpop.permute.xlu1 %993 }
 0xcea   : > { %998 = vst.msk [vmem:[#allocation2 + $0x8] sm:$0xff] %vm512_vm4, %v994_v62 }
 0xced   : > { %v1004_v63 = vpop.permute.xlu1 %1003  ;;  %v1012_v0 = vld [vmem:[#allocation4 + $0x18] sm:$0xff] }
 0xcee   : > { %1008 = vst.msk [vmem:[#allocation3 + $0x8] sm:$0xff] %vm512_vm4, %v1004_v63  ;;  %1484 = vmatmul.mubr.msk.bf16.gmra.mrb[12].mxu0 %vm512_vm4, %v1012_v0 }
 0xdc1   : > { %v1485_v1 = vpop.f32.mrb[12].mxu0 }
 0xdc2   : > { %v1107_v2 = vadd.f32 %v1485_v1, %v2437_v49  ;;  %v1098_v4 = vpop.f32.mrb[13].mxu0 }
 0xdc3   : > { %v1099_v5 = vadd.f32 %v2437_v49, %v1098_v4  ;;  %v1486_v6 = vpop.f32.mrb[14].mxu0 }
 0xdc4   : > { %v1110_v7 = vadd.f32 %v1486_v6, %v2437_v49  ;;  %v1101_v10 = vpop.f32.mrb[15].mxu0 }
 0xdc5   : > { %v1396_v11 = vpack.c.bf16 %v1107_v2, %v1099_v5  ;;  %v1102_v12 = vadd.f32 %v2437_v49, %v1101_v10 }
 0xdc7   : > { %1404 = vst [vmem:[%s2359_s21 + $0x8] sm:$0xff] %v1396_v11   ;;  %v1401_v8 = vpack.c.bf16 %v1110_v7, %v1102_v12 }
 0xdc9   : > { %1405 = vst [vmem:[%s2359_s21 + $0x18] sm:$0xff] %v1401_v8  }
 0xdca   : > { %1943 = shalt.err (!%p1940_p6)
}
 0xdcb   : > { %s1944_s16 = scalar_lea.hbm %s2483_s18, 512  ;;  %s1948_s11 = scalar_lea.hbm %s2545_s8, 1024 }
 0xdcc   : > { %p1945_p7 = scmp.ne.s32.totalorder %s2483_s18, %s1944_s16  ;;  %p1949_p0 = scmp.lt.u32.totalorder %s2483_s18, %s2545_s8 }
 0xdcd   : > { %p1950_p2 = scmp.lt.u32.totalorder %s1948_s11, %s1944_s16  ;;  %p1952_p1 = scmp.lt.u32.totalorder %s1944_s16, %s2483_s18 }
 0xdce   : > { %p1946_p9 = pnand %p1945_p7, %p2579_p4 }
 0xdcf   : > { %p1951_p13 = por %p1950_p2, %p1949_p0 }
 0xdd0   : > { %p1947_p12 = pneg %p1946_p9 }
 0xdd1   : > { %p1953_p8 = por %p1952_p1, %p1951_p13 }
 0xdd3   : > { %p1954_p10 = pnand %p1953_p8, %p1947_p12 }
 0xdd5   : > { %1957 = shalt.err (!%p1954_p10)
}
 0xdd6   : > { %s2049_s25 = smov 256   ;;  %s2050_s21 = smov 512  }
 0xdd7   : > { %s2051_s20 = smov 16  }
 0xdd8   : > { %1519 = dma.vmem_to_hbm [thread:$0]  (%p2579_p4), %s2485_s12, 512, %s2483_s18, %s2491_s30, %s2049_s25, %s2050_s21, %s2051_s20  }
 0xdd9 PF: > { %s2580_s3 = sld [smem:[#allocation29_spill]]  ;;  %p1566_p11 = scmp.ge.s32.totalorder %s2028_s10, 2 }
 0xdda   : > { %s1185_s24 = sand.u32 1, %s2008_s27  }
 0xddb   : > { %s1186_s22 = scalar_lea.sflag [#allocation7], %s1185_s24 }
 0xddf   : > { %p2581_p3 = scmp.ne.s32.totalorder %s2580_s3, 0 }
 0xde1   : > { %p1547_p5 = pnand %p1566_p11, %p2581_p3 }
 0xde3   : > { %2003 = dma.done.wait (!%p1547_p5), %s1186_s22, 512  }
 0xde4   : > { %2005 = vsyncadd (!%p1547_p5), %s1186_s22, 4294966784  ;;  %s26_s10 = sadd.s32 1, %s2028_s10   ;;  %s2582_s17 = sld [smem:[#allocation26_spill]] }
 0xde5   : > { %p23_p6 = scmp.ge.s32.totalorder %s26_s10, 4   ;;  %s2583_s29 = sld [smem:[#allocation30_spill]] }
 0xde6   : > { %s2584_s30 = sld [smem:[#allocation27_spill]]  ;;  %s2585_s9 = sld [smem:[#allocation28_spill]] }
 0xde7   : > { %s2586_s27 = smov %s2012_s28  ;;  %25 = sbr.rel (!%p23_p6) target bundleno = 13 (0xd), region = 125 }
 0xdea   : > { %s2587_s28 = smov %s2582_s17 }
 0xdee   :  { %1191 = vsyncpa [#allocation6], 1 }
 0xdef   :  { %1193 = vsyncpa [#allocation6 + $0x1], 1 }
 0xdf0   :  { %1194 = vsyncpa [#allocation9], 1 }
 0xdf1   :  { %1195 = vsyncpa [#allocation12], 1 }
 0xdf2   :  { %1196 = vsyncpa [#allocation15], 1 }
 0xdf3   :  { %1197 = vsyncpa [#allocation18], 1 }
 0xdf4   :  { %1198 = vsyncpa [#allocation7], 1 }
 0xdf5   :  { %1200 = vsyncpa [#allocation7 + $0x1], 1 }

</bundles_post_ra>
